<compile_context>
chip_gen: v7x
topology: tpu7x:2x2x1
jax: 0.10.0
libtpu: 0.0.40
codegen_flags: <defaults>
</compile_context>

<pallas_src>
import numpy as np
import jax
import jax.numpy as jnp
from jax.experimental import pallas as pl
from jax.experimental.pallas import tpu as pltpu

BATCH = 256          # >=128 so the kernel has a real batch grid to pipeline
INPUT_DIM = 4
BOND_DIM = 4
OUTPUT_DIM = 8
FULL = BOND_DIM ** INPUT_DIM   # 256
TILE_B = 128                   # batch rows per grid step
LANE = 128


def _round_up(x, m):
    return ((x + m - 1) // m) * m


def tn_classifier_kernel(x_ref, t0_ref, t1_ref, ct_ref, o_ref):
    # x_ref : (TILE_B, INPUT_DIM) f32   raw inputs for this batch tile
    # t0_ref: (INPUT_DIM, FULL)   f32   feature_maps[k, 0] expanded along its
    # t1_ref: (INPUT_DIM, FULL)   f32   digit of the flattened Kronecker index
    # ct_ref: (FULL, OUT_PAD)     f32   zero-padded central tensor
    # o_ref : (TILE_B, OUT_PAD)   f32
    x = x_ref[...]
    # contracted[b, idx] = prod_k feature_maps[k, x_bin[b, k], digit_k(idx)]
    contracted = jnp.where(x[:, 0:1] > 0.0, t1_ref[0:1, :], t0_ref[0:1, :])
    for k in range(1, INPUT_DIM):            # static unroll: VPU select + mul
        contracted = contracted * jnp.where(
            x[:, k:k + 1] > 0.0, t1_ref[k:k + 1, :], t0_ref[k:k + 1, :])
    # The one matmul that matters: (TILE_B, FULL) @ (FULL, OUT_PAD) on the MXU,
    # default precision (single bf16 pass, f32 accumulation), lane-dense store.
    o_ref[...] = jnp.dot(contracted, ct_ref[...],
                         preferred_element_type=jnp.float32)


def tn_classifier_forward(x, feature_maps, central_tensor, *, tile_b=TILE_B):
    batch, input_dim = x.shape
    bond_dim = feature_maps.shape[-1]
    full, output_dim = central_tensor.shape
    assert full == bond_dim ** input_dim
    tile_b = min(tile_b, batch)
    assert batch % tile_b == 0, "batch must be a multiple of the batch tile"

    # ---- parameter-only preprocessing (batch independent, tiny) ------------
    # digit_k(idx) = (idx // bond_dim**(input_dim-1-k)) % bond_dim matches the
    # torch einsum('bi,bj->bij') + reshape flattening (feature 0 slowest).
    strides = bond_dim ** (input_dim - 1 - np.arange(input_dim))
    digits = (np.arange(full)[None, :] // strides[:, None]) % bond_dim  # (F, FULL)
    idx = jnp.broadcast_to(
        jnp.asarray(digits, dtype=jnp.int32)[:, None, :], (input_dim, 2, full))
    table = jnp.take_along_axis(feature_maps, idx, axis=2)   # (F, 2, FULL)
    t0 = table[:, 0, :]                                      # (F, FULL)
    t1 = table[:, 1, :]                                      # (F, FULL)

    # Lane-dense output: pad the tiny output dim up to a multiple of 128.
    out_pad = _round_up(output_dim, LANE)
    ct_pad = jnp.pad(central_tensor, ((0, 0), (0, out_pad - output_dim)))

    grid = (batch // tile_b,)
    out = pl.pallas_call(
        tn_classifier_kernel,
        out_shape=jax.ShapeDtypeStruct((batch, out_pad), jnp.float32),
        grid=grid,
        in_specs=[
            pl.BlockSpec((tile_b, input_dim), lambda i: (i, 0)),
            pl.BlockSpec((input_dim, full), lambda i: (0, 0)),
            pl.BlockSpec((input_dim, full), lambda i: (0, 0)),
            pl.BlockSpec((full, out_pad), lambda i: (0, 0)),
        ],
        out_specs=pl.BlockSpec((tile_b, out_pad), lambda i: (i, 0)),
        compiler_params=pltpu.CompilerParams(
            dimension_semantics=("parallel",)),
        cost_estimate=pl.CostEstimate(
            flops=2 * batch * full * out_pad + 3 * batch * full * input_dim,
            transcendentals=0,
            bytes_accessed=4 * (batch * input_dim + 2 * input_dim * full
                                + full * out_pad + batch * out_pad)),
    )(x, t0, t1, ct_pad)
    return out[:, :output_dim]


def tn_classifier_reference(x, feature_maps, central_tensor):
    """Pure-JAX reference for the (intended) torch semantics, f32/HIGHEST."""
    batch, input_dim = x.shape
    x_bin = (x > 0).astype(jnp.float32)
    mapped = []
    for i in range(input_dim):
        b = x_bin[:, i:i + 1]
        onehot = jnp.concatenate([1.0 - b, b], axis=1)                   # (B, 2)
        mapped.append(jnp.matmul(onehot, feature_maps[i],
                                 precision=jax.lax.Precision.HIGHEST))   # (B, D)
    contracted = mapped[0]
    for i in range(1, input_dim):
        contracted = jnp.einsum('bi,bj->bij', contracted, mapped[i]).reshape(
            batch, -1)
    return jnp.matmul(contracted, central_tensor,
                      precision=jax.lax.Precision.HIGHEST)


if __name__ == "__main__":
    key = jax.random.PRNGKey(0)
    kx, kf, kc = jax.random.split(key, 3)

    # Shapes implied by __init__: feature_maps stacked -> (F, 2, D),
    # central_tensor -> (D**F, output_dim).
    x = jax.random.normal(kx, (BATCH, INPUT_DIM), dtype=jnp.float32)
    feature_maps = jax.random.normal(kf, (INPUT_DIM, 2, BOND_DIM),
                                     dtype=jnp.float32)
    central_tensor = jax.random.normal(kc, (FULL, OUTPUT_DIM),
                                       dtype=jnp.float32)

    fwd = jax.jit(tn_classifier_forward)
    out = jax.block_until_ready(fwd(x, feature_maps, central_tensor))

    ref = tn_classifier_reference(x, feature_maps, central_tensor)
    out_np, ref_np = np.asarray(out), np.asarray(ref)
    assert out_np.shape == (BATCH, OUTPUT_DIM)
    # The kernel's classification matmul uses DEFAULT precision (single bf16
    # MXU pass) per the perf review, so compare relative to the output scale
    # instead of the tight f32 tolerance used with Precision.HIGHEST.
    scale = max(float(np.max(np.abs(ref_np))), 1e-6)
    rel_err = float(np.max(np.abs(out_np - ref_np))) / scale
    assert rel_err < 2e-2, f"relative error too large: {rel_err}"
    print("KERNEL_OK")
</pallas_src>

<mosaic_0001>
module attributes {stable_mosaic.version = 11 : i64} {
  func.func @tn_classifier_kernel(%arg0: i32, %arg1: memref<128x4xf32, #tpu.memory_space<vmem>>, %arg2: memref<4x256xf32, #tpu.memory_space<vmem>>, %arg3: memref<4x256xf32, #tpu.memory_space<vmem>>, %arg4: memref<256x128xf32, #tpu.memory_space<vmem>>, %arg5: memref<128x128xf32, #tpu.memory_space<vmem>>) attributes {dimension_semantics = [#tpu.dimension_semantics<parallel>], iteration_bounds = array<i64: 2>, scalar_prefetch = 0 : i64, scratch_operands = 0 : i64, tpu.core_type = #tpu.core_type<tc>, window_params = [{transform_indices = @transform_0, window_bounds = array<i64: 128, 4>}, {pipeline_mode = #tpu.pipeline_mode<synchronous>, transform_indices = @transform_1, window_bounds = array<i64: 4, 256>}, {pipeline_mode = #tpu.pipeline_mode<synchronous>, transform_indices = @transform_2, window_bounds = array<i64: 4, 256>}, {pipeline_mode = #tpu.pipeline_mode<synchronous>, transform_indices = @transform_3, window_bounds = array<i64: 256, 128>}, {transform_indices = @transform_4, window_bounds = array<i64: 128, 128>}]} {
    %c0 = arith.constant 0 : index
    %c0_0 = arith.constant 0 : index
    %0 = vector.load %arg1[%c0, %c0_0] : memref<128x4xf32, #tpu.memory_space<vmem>>, vector<128x4xf32>
    %1 = vector.extract_strided_slice %0 {offsets = [0, 0], sizes = [128, 1], strides = [1, 1]} : vector<128x4xf32> to vector<128x1xf32>
    %cst = arith.constant 0.000000e+00 : f32
    %2 = vector.broadcast %cst : f32 to vector<128x1xf32>
    %3 = arith.cmpf ogt, %1, %2 : vector<128x1xf32>
    %c0_1 = arith.constant 0 : index
    %c0_2 = arith.constant 0 : index
    %4 = vector.load %arg3[%c0_1, %c0_2] : memref<4x256xf32, #tpu.memory_space<vmem>>, vector<1x256xf32>
    %c0_3 = arith.constant 0 : index
    %c0_4 = arith.constant 0 : index
    %5 = vector.load %arg2[%c0_3, %c0_4] : memref<4x256xf32, #tpu.memory_space<vmem>>, vector<1x256xf32>
    %6 = vector.shape_cast %3 : vector<128x1xi1> to vector<128x1xi1>
    %7 = vector.broadcast %6 : vector<128x1xi1> to vector<128x256xi1>
    %8 = vector.shape_cast %4 : vector<1x256xf32> to vector<1x256xf32>
    %9 = vector.broadcast %8 : vector<1x256xf32> to vector<128x256xf32>
    %10 = vector.shape_cast %5 : vector<1x256xf32> to vector<1x256xf32>
    %11 = vector.broadcast %10 : vector<1x256xf32> to vector<128x256xf32>
    %12 = arith.select %7, %9, %11 : vector<128x256xi1>, vector<128x256xf32>
    %13 = vector.extract_strided_slice %0 {offsets = [0, 1], sizes = [128, 1], strides = [1, 1]} : vector<128x4xf32> to vector<128x1xf32>
    %cst_5 = arith.constant 0.000000e+00 : f32
    %14 = vector.broadcast %cst_5 : f32 to vector<128x1xf32>
    %15 = arith.cmpf ogt, %13, %14 : vector<128x1xf32>
    %c1 = arith.constant 1 : index
    %c0_6 = arith.constant 0 : index
    %16 = vector.load %arg3[%c1, %c0_6] : memref<4x256xf32, #tpu.memory_space<vmem>>, vector<1x256xf32>
    %c1_7 = arith.constant 1 : index
    %c0_8 = arith.constant 0 : index
    %17 = vector.load %arg2[%c1_7, %c0_8] : memref<4x256xf32, #tpu.memory_space<vmem>>, vector<1x256xf32>
    %18 = vector.shape_cast %15 : vector<128x1xi1> to vector<128x1xi1>
    %19 = vector.broadcast %18 : vector<128x1xi1> to vector<128x256xi1>
    %20 = vector.shape_cast %16 : vector<1x256xf32> to vector<1x256xf32>
    %21 = vector.broadcast %20 : vector<1x256xf32> to vector<128x256xf32>
    %22 = vector.shape_cast %17 : vector<1x256xf32> to vector<1x256xf32>
    %23 = vector.broadcast %22 : vector<1x256xf32> to vector<128x256xf32>
    %24 = arith.select %19, %21, %23 : vector<128x256xi1>, vector<128x256xf32>
    %25 = arith.mulf %12, %24 : vector<128x256xf32>
    %26 = vector.extract_strided_slice %0 {offsets = [0, 2], sizes = [128, 1], strides = [1, 1]} : vector<128x4xf32> to vector<128x1xf32>
    %cst_9 = arith.constant 0.000000e+00 : f32
    %27 = vector.broadcast %cst_9 : f32 to vector<128x1xf32>
    %28 = arith.cmpf ogt, %26, %27 : vector<128x1xf32>
    %c2 = arith.constant 2 : index
    %c0_10 = arith.constant 0 : index
    %29 = vector.load %arg3[%c2, %c0_10] : memref<4x256xf32, #tpu.memory_space<vmem>>, vector<1x256xf32>
    %c2_11 = arith.constant 2 : index
    %c0_12 = arith.constant 0 : index
    %30 = vector.load %arg2[%c2_11, %c0_12] : memref<4x256xf32, #tpu.memory_space<vmem>>, vector<1x256xf32>
    %31 = vector.shape_cast %28 : vector<128x1xi1> to vector<128x1xi1>
    %32 = vector.broadcast %31 : vector<128x1xi1> to vector<128x256xi1>
    %33 = vector.shape_cast %29 : vector<1x256xf32> to vector<1x256xf32>
    %34 = vector.broadcast %33 : vector<1x256xf32> to vector<128x256xf32>
    %35 = vector.shape_cast %30 : vector<1x256xf32> to vector<1x256xf32>
    %36 = vector.broadcast %35 : vector<1x256xf32> to vector<128x256xf32>
    %37 = arith.select %32, %34, %36 : vector<128x256xi1>, vector<128x256xf32>
    %38 = arith.mulf %25, %37 : vector<128x256xf32>
    %39 = vector.extract_strided_slice %0 {offsets = [0, 3], sizes = [128, 1], strides = [1, 1]} : vector<128x4xf32> to vector<128x1xf32>
    %cst_13 = arith.constant 0.000000e+00 : f32
    %40 = vector.broadcast %cst_13 : f32 to vector<128x1xf32>
    %41 = arith.cmpf ogt, %39, %40 : vector<128x1xf32>
    %c3 = arith.constant 3 : index
    %c0_14 = arith.constant 0 : index
    %42 = vector.load %arg3[%c3, %c0_14] : memref<4x256xf32, #tpu.memory_space<vmem>>, vector<1x256xf32>
    %c3_15 = arith.constant 3 : index
    %c0_16 = arith.constant 0 : index
    %43 = vector.load %arg2[%c3_15, %c0_16] : memref<4x256xf32, #tpu.memory_space<vmem>>, vector<1x256xf32>
    %44 = vector.shape_cast %41 : vector<128x1xi1> to vector<128x1xi1>
    %45 = vector.broadcast %44 : vector<128x1xi1> to vector<128x256xi1>
    %46 = vector.shape_cast %42 : vector<1x256xf32> to vector<1x256xf32>
    %47 = vector.broadcast %46 : vector<1x256xf32> to vector<128x256xf32>
    %48 = vector.shape_cast %43 : vector<1x256xf32> to vector<1x256xf32>
    %49 = vector.broadcast %48 : vector<1x256xf32> to vector<128x256xf32>
    %50 = arith.select %45, %47, %49 : vector<128x256xi1>, vector<128x256xf32>
    %51 = arith.mulf %38, %50 : vector<128x256xf32>
    %c0_17 = arith.constant 0 : index
    %c0_18 = arith.constant 0 : index
    %52 = vector.load %arg4[%c0_17, %c0_18] : memref<256x128xf32, #tpu.memory_space<vmem>>, vector<256x128xf32>
    %cst_19 = arith.constant dense<0.000000e+00> : vector<128x128xf32>
    %53 = tpu.matmul %51, %52, %cst_19 {dimension_numbers = #tpu.dot_dimension_numbers<[1], [0], [0], [1], [0, 0, 1, 1], [], []>} : vector<128x256xf32>, vector<256x128xf32>, vector<128x128xf32> -> vector<128x128xf32>
    %c0_20 = arith.constant 0 : index
    %c0_21 = arith.constant 0 : index
    %54 = vector.load %arg5[%c0_20, %c0_21] : memref<128x128xf32, #tpu.memory_space<vmem>>, vector<128x128xf32>
    tpu.vector_store %arg5[%c0_20, %c0_21], %53 {strides = array<i32>} : memref<128x128xf32, #tpu.memory_space<vmem>>, vector<128x128xf32>,
    return
  }
  func.func @transform_0(%arg0: i32) -> (i32, i32) {
    %c0_i32 = arith.constant 0 : i32
    %c0_i32_0 = arith.constant 0 : i32
    return %arg0, %c0_i32 : i32, i32
  }
  func.func @transform_1(%arg0: i32) -> (i32, i32) {
    %c0_i32 = arith.constant 0 : i32
    %c0_i32_0 = arith.constant 0 : i32
    %c0_i32_1 = arith.constant 0 : i32
    return %c0_i32, %c0_i32_0 : i32, i32
  }
  func.func @transform_2(%arg0: i32) -> (i32, i32) {
    %c0_i32 = arith.constant 0 : i32
    %c0_i32_0 = arith.constant 0 : i32
    %c0_i32_1 = arith.constant 0 : i32
    return %c0_i32, %c0_i32_0 : i32, i32
  }
  func.func @transform_3(%arg0: i32) -> (i32, i32) {
    %c0_i32 = arith.constant 0 : i32
    %c0_i32_0 = arith.constant 0 : i32
    %c0_i32_1 = arith.constant 0 : i32
    return %c0_i32, %c0_i32_0 : i32, i32
  }
  func.func @transform_4(%arg0: i32) -> (i32, i32) {
    %c0_i32 = arith.constant 0 : i32
    %c0_i32_0 = arith.constant 0 : i32
    return %arg0, %c0_i32 : i32, i32
  }
}

</mosaic_0001>

<bundles_post_ra>
// kernel: tn_classifier_forward.1
= control target key start
LH: loop header
LB: loop body
LE: loop exit
PB: predicated region body
PF: predicated region fallthrough
CT: control target
= control target key end

     0   :  { %s1311_s15 = smov 0   ;;  %s2068_s0 = inlined_call_operand.vmem [shape: f32[256,4], index: 0, kind: input, shape index: {}]   ;;  %s2069_s1 = inlined_call_operand.vmem [shape: f32[4,256], index: 1, kind: input, shape index: {}]   ;;  %s2070_s2 = inlined_call_operand.vmem [shape: f32[4,256], index: 2, kind: input, shape index: {}]   ;;  %s2071_s3 = inlined_call_operand.vmem [shape: f32[256,128], index: 3, kind: input, shape index: {}]   ;;  %s2072_s4 = inlined_call_operand.vmem [shape: f32[256,128], index: 4, kind: output, shape index: {}]  }
   0x1 LB: > { %s1080_s16 = sadd.s32 4294967295, %s1280_s15   ;;  %p1084_p0 = scmp.ge.s32.totalorder %s1280_s15, 1  ;;  %s1280_s15 = sphi %s1311_s15, %s14_s15  }
   0x2   : > { %p163_p1 = scmp.lt.s32.totalorder %s1280_s15, 3 }
   0x4   : > { %p164_p2 = pnand %p1084_p0, %p163_p1 }
   0x5   : > { %s1085_s17 = sshll.u32 (!%p164_p2), %s1080_s16, 4  ;;  %v1282_v0 = vmov (!%p164_p2), 2   ;;  %v1283_v1 = vmov (!%p164_p2), 1   ;;  %v1284_v5 = vmov (!%p164_p2), 0   ;;  %v847_v17 = vld [vmem:[%s2071_s3 + $0x80] sm:$0xff] (!%p164_p2)  ;;  %v848_v18 = vld [vmem:[%s2071_s3 + $0x88] sm:$0xff] (!%p164_p2) }
   0x6   : > { %167 = sbr.rel (%p164_p2) target bundleno = 562 (0x232), region = 36  ;;  %1238 = vset.pattern.permute.xlu0 (!%p164_p2), %v1282_v0  ;;  %1237 = vset.pattern.permute.xlu1 (!%p164_p2), %v1283_v1  ;;  %p190_p3 = scmp.lt.s32.totalorder (!%p164_p2), %s1085_s17, 31  ;;  %v831_v19 = vld [vmem:[%s2071_s3] sm:$0xff] (!%p164_p2)  ;;  %v1177_v21 = vpack.c.bf16 (!%p164_p2), %v848_v18, %v847_v17  ;;  %v832_v22 = vld [vmem:[%s2071_s3 + $0x8] sm:$0xff] (!%p164_p2)  ;;  %v849_v25 = vld [vmem:[%s2071_s3 + $0x90] sm:$0xff] (!%p164_p2)  ;;  %v1285_v47 = vmov (!%p164_p2), 3  }
   0x7   : > { %v1179_v23 = vpack.c.bf16 (!%p164_p2), %v832_v22, %v831_v19  ;;  %v850_v26 = vld [vmem:[%s2071_s3 + $0x98] sm:$0xff] (!%p164_p2)  ;;  %v833_v28 = vld [vmem:[%s2071_s3 + $0x10] sm:$0xff] (!%p164_p2)  ;;  %v851_v33 = vld [vmem:[%s2071_s3 + $0xa0] sm:$0xff] (!%p164_p2) }
   0x8   : > { %1209 = vmatprep.subr.bf16.mxu1 (!%p164_p2), %v1177_v21  ;;  %v1181_v27 = vpack.c.bf16 (!%p164_p2), %v850_v26, %v849_v25  ;;  %v834_v29 = vld [vmem:[%s2071_s3 + $0x18] sm:$0xff] (!%p164_p2)  ;;  %1178 = vmatprep.subr.bf16.mxu0 (!%p164_p2), %v1177_v21  ;;  %v852_v34 = vld [vmem:[%s2071_s3 + $0xa8] sm:$0xff] (!%p164_p2)  ;;  %v835_v36 = vld [vmem:[%s2071_s3 + $0x20] sm:$0xff] (!%p164_p2) }
   0x9   : > { %1217 = vmatpush3.bf16.msra.mxu1 (!%p164_p2), %v1179_v23  ;;  %v1183_v31 = vpack.c.bf16 (!%p164_p2), %v834_v29, %v833_v28  ;;  %1180 = vmatpush3.bf16.msra.mxu0 (!%p164_p2), %v1179_v23  ;;  %v1185_v35 = vpack.c.bf16 (!%p164_p2), %v852_v34, %v851_v33  ;;  %v836_v37 = vld [vmem:[%s2071_s3 + $0x28] sm:$0xff] (!%p164_p2)  ;;  %v853_v40 = vld [vmem:[%s2071_s3 + $0xb0] sm:$0xff] (!%p164_p2)  ;;  %v854_v41 = vld [vmem:[%s2071_s3 + $0xb8] sm:$0xff] (!%p164_p2) }
   0xa   : > { %1210 = vmatprep.subr.bf16.mxu1 (!%p164_p2), %v1181_v27  ;;  %v1187_v39 = vpack.c.bf16 (!%p164_p2), %v836_v37, %v835_v36  ;;  %1182 = vmatprep.subr.bf16.mxu0 (!%p164_p2), %v1181_v27  ;;  %v1189_v42 = vpack.c.bf16 (!%p164_p2), %v854_v41, %v853_v40  ;;  %v837_v43 = vld [vmem:[%s2071_s3 + $0x30] sm:$0xff] (!%p164_p2)  ;;  %v838_v44 = vld [vmem:[%s2071_s3 + $0x38] sm:$0xff] (!%p164_p2)  ;;  %v855_v48 = vld [vmem:[%s2071_s3 + $0xc0] sm:$0xff] (!%p164_p2) }
   0xb   : > { %v1191_v46 = vpack.c.bf16 (!%p164_p2), %v838_v44, %v837_v43  ;;  %v856_v49 = vld [vmem:[%s2071_s3 + $0xc8] sm:$0xff] (!%p164_p2)  ;;  %v839_v51 = vld [vmem:[%s2071_s3 + $0x40] sm:$0xff] (!%p164_p2)  ;;  %v857_v54 = vld [vmem:[%s2071_s3 + $0xd0] sm:$0xff] (!%p164_p2) }
   0xc   : > { %v1193_v50 = vpack.c.bf16 (!%p164_p2), %v856_v49, %v855_v48  ;;  %v840_v52 = vld [vmem:[%s2071_s3 + $0x48] sm:$0xff] (!%p164_p2)  ;;  %v858_v55 = vld [vmem:[%s2071_s3 + $0xd8] sm:$0xff] (!%p164_p2)  ;;  %v841_v58 = vld [vmem:[%s2071_s3 + $0x50] sm:$0xff] (!%p164_p2) }
   0xd   : > { %s2074_s17 = smov (!%p190_p3, %s1085_s17), 31  ;;  %1218 = vmatpush3.bf16.msra.mxu1 %v1183_v31  ;;  %1184 = vmatpush3.bf16.msra.mxu0 %v1183_v31  ;;  %v1195_v53 = vpack.c.bf16 %v840_v52, %v839_v51  ;;  %v1197_v57 = vpack.c.bf16 %v858_v55, %v857_v54  ;;  %v842_v59 = vld [vmem:[%s2071_s3 + $0x58] sm:$0xff]  ;;  %v859_v61 = vld [vmem:[%s2071_s3 + $0xe0] sm:$0xff]  ;;  %v860_v62 = vld [vmem:[%s2071_s3 + $0xe8] sm:$0xff] }
   0xe   : > { %s1086_s18 = sshll.u32 %s2074_s17, 3  ;;  %1211 = vmatprep.subr.bf16.mxu1 %v1185_v35  ;;  %1186 = vmatprep.subr.bf16.mxu0 %v1185_v35  ;;  %v1199_v60 = vpack.c.bf16 %v842_v59, %v841_v58  ;;  %v1201_v63 = vpack.c.bf16 %v860_v62, %v859_v61  ;;  %v1090_v43 = vld [vmem:[%s2069_s1 + $0x1] ss:$4 sm:$0x3] }
   0xf   : > { %s1329_s21 = scalar_lea.vmem %s2068_s0, %s1086_s18  ;;  %v1092_v44 = vld [vmem:[%s2069_s1 + $0x2] ss:$4 sm:$0x3]  ;;  %v233_v48 = vld [vmem:[%s2070_s2] ss:$4 sm:$0x3]  ;;  %s2047_s11 = scalar_lea.vmem %s2072_s4, %s1086_s18 }
  0x10   : > { %v201_v2 = vld [vmem:[%s1329_s21] sm:$0xff]  ;;  %v210_v3 = vld [vmem:[%s1329_s21 + $0x48] sm:$0xff]  ;;  %v204_v7 = vld [vmem:[%s1329_s21 + $0x18] sm:$0xff] }
  0x11   : > { %v209_v4 = vld [vmem:[%s1329_s21 + $0x40] sm:$0xff]  ;;  %vm217_vm0 = vcmp.gt.f32.partialorder %v201_v2, 0.0  ;;  %vm226_vm1 = vcmp.gt.f32.partialorder %v210_v3, 0.0  ;;  %vm220_vm3 = vcmp.gt.f32.partialorder %v204_v7, 0.0  ;;  %v202_v12 = vld [vmem:[%s1329_s21 + $0x8] sm:$0xff]  ;;  %v203_v13 = vld [vmem:[%s1329_s21 + $0x10] sm:$0xff]  ;;  %1219 = vmatpush3.bf16.msra.mxu1 %v1187_v39  ;;  %1188 = vmatpush3.bf16.msra.mxu0 %v1187_v39 }
  0x12   : > { %vm225_vm2 = vcmp.gt.f32.partialorder %v209_v4, 0.0  ;;  %v1335_v6 = vsel %vm217_vm0, 1, %v1284_v5  ;;  %v1341_v8 = vsel %vm226_vm1, 1, %v1284_v5  ;;  %v213_v10 = vld [vmem:[%s1329_s21 + $0x60] sm:$0xff]  ;;  %v1350_v11 = vsel %vm220_vm3, 1, %v1284_v5  ;;  %v212_v16 = vld [vmem:[%s1329_s21 + $0x58] sm:$0xff]  ;;  %1212 = vmatprep.subr.bf16.mxu1 %v1189_v42  ;;  %1190 = vmatprep.subr.bf16.mxu0 %v1189_v42 }
  0x13   : > { %528 = vperm.xlu0 %1238, %v1335_v6   ;;  %374 = vperm.xlu1 %1237, %v1335_v6   ;;  %v1344_v9 = vsel %vm225_vm2, 1, %v1284_v5  ;;  %vm229_vm4 = vcmp.gt.f32.partialorder %v213_v10, 0.0  ;;  %vm218_vm5 = vcmp.gt.f32.partialorder %v202_v12, 0.0  ;;  %vm219_vm6 = vcmp.gt.f32.partialorder %v203_v13, 0.0  ;;  %v206_v24 = vld [vmem:[%s1329_s21 + $0x28] sm:$0xff]  ;;  %v215_v32 = vld [vmem:[%s1329_s21 + $0x70] sm:$0xff] }
  0x14   : > { %v1358_v14 = vsel %vm229_vm4, 1, %v1284_v5  ;;  %v1361_v15 = vsel %vm218_vm5, 1, %v1284_v5  ;;  %v1377_v20 = vsel %vm219_vm6, 1, %v1284_v5  ;;  %vm228_vm7 = vcmp.gt.f32.partialorder %v212_v16, 0.0  ;;  %v211_v56 = vld [vmem:[%s1329_s21 + $0x50] sm:$0xff]  ;;  %v843_v2 = vld [vmem:[%s2071_s3 + $0x60] sm:$0xff] }
  0x15   : > { %v1399_v30 = vsel %vm228_vm7, 1, %v1284_v5  ;;  %vm222_vm8 = vcmp.gt.f32.partialorder %v206_v24, 0.0  ;;  %vm231_vm9 = vcmp.gt.f32.partialorder %v215_v32, 0.0  ;;  %1220 = vmatpush3.bf16.msra.mxu1 %v1191_v46  ;;  %1192 = vmatpush3.bf16.msra.mxu0 %v1191_v46  ;;  %vm227_vm10 = vcmp.gt.f32.partialorder %v211_v56, 0.0  ;;  %v844_v3 = vld [vmem:[%s2071_s3 + $0x68] sm:$0xff]  ;;  %v861_v10 = vld [vmem:[%s2071_s3 + $0xf0] sm:$0xff] }
  0x16   : > { %v1417_v38 = vsel %vm222_vm8, 1, %v1284_v5  ;;  %v1434_v45 = vsel %vm231_vm9, 1, %v1284_v5  ;;  %1213 = vmatprep.subr.bf16.mxu1 %v1193_v50  ;;  %1194 = vmatprep.subr.bf16.mxu0 %v1193_v50  ;;  %v245_v4 = vsel %vm227_vm10, 1, %v1284_v5  ;;  %v1203_v7 = vpack.c.bf16 %v844_v3, %v843_v2  ;;  %v862_v12 = vld [vmem:[%s2071_s3 + $0xf8] sm:$0xff]  ;;  %v207_v18 = vld [vmem:[%s1329_s21 + $0x30] sm:$0xff] }
  0x17   : > { %555 = vperm.xlu0 %1238, %v1341_v8   ;;  %398 = vperm.xlu1 %1237, %v1344_v9   ;;  %v1205_v13 = vpack.c.bf16 %v862_v12, %v861_v10  ;;  %v846_v16 = vld [vmem:[%s2071_s3 + $0x78] sm:$0xff]  ;;  %vm223_vm11 = vcmp.gt.f32.partialorder %v207_v18, 0.0  ;;  %v316_v32 = vlaneseq  ;;  %v1089_v42 = vld [vmem:[%s2070_s2 + $0x1] ss:$4 sm:$0x3] }
  0x18   : > { %v216_v19 = vld [vmem:[%s1329_s21 + $0x78] sm:$0xff]  ;;  %v1504_v21 = vsel %vm223_vm11, 1, %v1284_v5  ;;  %v234_v49 = vld [vmem:[%s2069_s1] ss:$4 sm:$0x3] }
  0x19   : > { %1221 = vmatpush3.bf16.msra.mxu1 %v1195_v53  ;;  %1196 = vmatpush3.bf16.msra.mxu0 %v1195_v53  ;;  %vm232_vm12 = vcmp.gt.f32.partialorder %v216_v19, 0.0  ;;  %v317_v35 = vshrl.u32 %v316_v32, 7  ;;  %v208_v39 = vld [vmem:[%s1329_s21 + $0x38] sm:$0xff]  ;;  %v1093_v55 = vld [vmem:[%s2070_s2 + $0x3] ss:$4 sm:$0x3] }
  0x1a   : > { %1214 = vmatprep.subr.bf16.mxu1 %v1197_v57  ;;  %1198 = vmatprep.subr.bf16.mxu0 %v1197_v57  ;;  %v1509_v22 = vsel %vm232_vm12, 1, %v1284_v5  ;;  %vm224_vm15 = vcmp.gt.f32.partialorder %v208_v39, 0.0  ;;  %v1094_v56 = vld [vmem:[%s2069_s1 + $0x3] ss:$4 sm:$0x3] }
  0x1b   : > { %537 = vperm.xlu0 %1238, %v1350_v11   ;;  %1239 = vset.pattern.permute.xlu1 %v1282_v0  ;;  %v318_v40 = vsub.s32 0, %v317_v35  ;;  %v322_v41 = vsub.s32 1, %v317_v35 }
  0x1c   : > { %552 = vperm.xlu1 %1239, %v1344_v9  }
  0x1d   : > { %1222 = vmatpush3.bf16.msra.mxu1 %v1199_v60  ;;  %1200 = vmatpush3.bf16.msra.mxu0 %v1199_v60  ;;  %v1607_v51 = vrot.slane %v1089_v42, %v318_v40  ;;  %v1609_v52 = vrot.slane %v1089_v42, %v322_v41  ;;  %v1611_v53 = vrot.slane %v1090_v43, %v318_v40  ;;  %v1628_v60 = vsel %vm224_vm15, 1, %v1284_v5 }
  0x1e   : > { %1215 = vmatprep.subr.bf16.mxu1 %v1201_v63  ;;  %1202 = vmatprep.subr.bf16.mxu0 %v1201_v63  ;;  %v1613_v54 = vrot.slane %v1090_v43, %v322_v41  ;;  %v1625_v59 = vrot.slane %v1092_v44, %v318_v40  ;;  %v1630_v61 = vrot.slane %v1092_v44, %v322_v41 }
  0x1f   : > { %564 = vperm.xlu0 %1238, %v1358_v14   ;;  %v1633_v62 = vrot.slane %v233_v48, %v318_v40  ;;  %v1635_v63 = vrot.slane %v233_v48, %v322_v41  ;;  %v1637_v2 = vrot.slane %v234_v49, %v318_v40  ;;  %v1639_v3 = vrot.slane %v234_v49, %v322_v41 }
  0x20   : > { %1240 = vset.pattern.permute.xlu1 %v1284_v5 }
  0x21   : > { %255 = vperm.xlu1 %1240, %v1361_v15   ;;  %1223 = vmatpush3.bf16.msra.mxu1 %v1203_v7 }
  0x22   : > { %1216 = vmatprep.subr.bf16.mxu1 %v1205_v13  ;;  %1204 = vmatpush3.bf16.msra.mxu0 %v1203_v7  ;;  %v1643_v7 = vrot.slane %v1094_v56, %v318_v40 }
  0x23   : > { %1256 = vset.pattern.permute.xlu0 %v1283_v1  ;;  %1206 = vmatprep.subr.bf16.mxu0 %v1205_v13  ;;  %v1650_v13 = vrot.slane %v1093_v55, %v322_v41 }
  0x24   : > { %380 = vperm.xlu0 %1256, %v1377_v20  }
  0x25   : > { %1241 = vset.pattern.permute.xlu1 %v1283_v1 }
  0x26   : > { %377 = vperm.xlu1 %1241, %v1361_v15  }
  0x28   : > { %407 = vperm.xlu0 %1256, %v1399_v30  }
  0x2a   : > { %401 = vperm.xlu1 %1241, %v1341_v8  }
  0x2c   : > { %389 = vperm.xlu0 %1256, %v1417_v38  }
  0x2e   : > { %1242 = vset.pattern.permute.xlu1 %v1285_v47 }
  0x2f   : > { %706 = vperm.xlu1 %1242, %v1344_v9  }
  0x30   : > { %416 = vperm.xlu0 %1256, %v1434_v45  }
  0x33   : > { %1243 = vset.pattern.permute.xlu1 %v1282_v0 }
  0x34   : > { %1263 = vset.pattern.permute.xlu0 %v1284_v5  ;;  %531 = vperm.xlu1 %1243, %v1361_v15  }
  0x35   : > { %252 = vperm.xlu0 %1263, %v1335_v6  }
  0x38   : > { %1244 = vset.pattern.permute.xlu1 %v1284_v5 }
  0x39   : > { %276 = vperm.xlu0 %1263, %v1344_v9   ;;  %258 = vperm.xlu1 %1244, %v1377_v20   ;;  %v845_v9 = vld [vmem:[%s2071_s3 + $0x70] sm:$0xff] }
  0x3a   : > { %v1207_v17 = vpack.c.bf16 %v846_v16, %v845_v9  ;;  %v1652_v9 = vrot.slane %v1094_v56, %v322_v41 }
  0x3c   : > { %1224 = vmatpush3.bf16.msra.mxu1 %v1207_v17  ;;  %1208 = vmatpush3.bf16.msra.mxu0 %v1207_v17 }
  0x3d   : > { %279 = vperm.xlu0 %1263, %v1341_v8   ;;  %282 = vperm.xlu1 %1244, %v245_v4  }
  0x41   : > { %261 = vperm.xlu0 %1263, %v1350_v11   ;;  %1245 = vset.pattern.permute.xlu1 %v1283_v1 }
  0x42   : > { %404 = vperm.xlu1 %1245, %v245_v4  }
  0x45   : > { %288 = vperm.xlu0 %1263, %v1358_v14  }
  0x46   : > { %1246 = vset.pattern.permute.xlu1 %v1285_v47 }
  0x47   : > { %685 = vperm.xlu1 %1246, %v1361_v15  }
  0x49   : > { %270 = vperm.xlu0 %1263, %v1504_v21  }
  0x4b   : > { %1247 = vset.pattern.permute.xlu1 %v1282_v0 }
  0x4c   : > { %534 = vperm.xlu1 %1247, %v1377_v20  }
  0x4d   : > { %297 = vperm.xlu0 %1263, %v1509_v22  }
  0x50   : > { %558 = vperm.xlu1 %1247, %v245_v4  }
  0x51   : > { %1267 = vset.pattern.permute.xlu0 %v1285_v47 }
  0x52   : > { %682 = vperm.xlu0 %1267, %v1335_v6   ;;  %v205_v6 = vld [vmem:[%s1329_s21 + $0x20] sm:$0xff] }
  0x53   : > { %vm221_vm13 = vcmp.gt.f32.partialorder %v205_v6, 0.0 }
  0x54   : > { %1248 = vset.pattern.permute.xlu1 %v1284_v5 }
  0x55   : > { %285 = vperm.xlu1 %1248, %v1399_v30  }
  0x56   : > { %709 = vperm.xlu0 %1267, %v1341_v8   ;;  %v239_v8 = vsel %vm221_vm13, 1, %v1284_v5 }
  0x59   : > { %1249 = vset.pattern.permute.xlu1 %v1283_v1 }
  0x5a   : > { %383 = vperm.xlu1 %1249, %v1350_v11   ;;  %691 = vperm.xlu0 %1267, %v1350_v11   ;;  %v214_v11 = vld [vmem:[%s1329_s21 + $0x68] sm:$0xff] }
  0x5b   : > { %vm230_vm14 = vcmp.gt.f32.partialorder %v214_v11, 0.0 }
  0x5c   : > { %v248_v15 = vsel %vm230_vm14, 1, %v1284_v5 }
  0x5e   : > { %1250 = vset.pattern.permute.xlu1 %v1285_v47  ;;  %718 = vperm.xlu0 %1267, %v1358_v14  }
  0x5f   : > { %688 = vperm.xlu1 %1250, %v1377_v20  }
  0x62   : > { %700 = vperm.xlu0 %1267, %v1504_v21  }
  0x63   : > { %712 = vperm.xlu1 %1250, %v245_v4   ;;  %v1641_v4 = vrot.slane %v1093_v55, %v318_v40 }
  0x66   : > { %1269 = vset.pattern.permute.xlu0 %v1282_v0 }
  0x67   : > { %1251 = vset.pattern.permute.xlu1 %v1282_v0  ;;  %546 = vperm.xlu0 %1269, %v1504_v21  }
  0x68   : > { %561 = vperm.xlu1 %1251, %v1399_v30  }
  0x6b   : > { %573 = vperm.xlu0 %1269, %v1509_v22  }
  0x6c   : > { %1252 = vset.pattern.permute.xlu1 %v1284_v5 }
  0x6d   : > { %264 = vperm.xlu1 %1252, %v239_v8  }
  0x6f   : > { %1273 = vset.pattern.permute.xlu0 %v1285_v47 }
  0x71   : > { %1253 = vset.pattern.permute.xlu1 %v1283_v1 }
  0x72   : > { %386 = vperm.xlu1 %1253, %v239_v8  }
  0x76   : > { %410 = vperm.xlu1 %1253, %v1358_v14  }
  0x7a   : > { %1254 = vset.pattern.permute.xlu1 %v1285_v47 }
  0x7b   : > { %715 = vperm.xlu1 %1254, %v1399_v30  }
  0x7f   : > { %1255 = vset.pattern.permute.xlu1 %v1282_v0 }
  0x80   : > { %540 = vperm.xlu1 %1255, %v239_v8  }
  0x84   : > { %1257 = vset.pattern.permute.xlu1 %v1284_v5 }
  0x85   : > { %267 = vperm.xlu1 %1257, %v1417_v38  }
  0x89   : > { %291 = vperm.xlu1 %1257, %v248_v15  }
  0x8d   : > { %1258 = vset.pattern.permute.xlu1 %v1283_v1 }
  0x8e   : > { %413 = vperm.xlu1 %1258, %v248_v15  }
  0x92   : > { %1259 = vset.pattern.permute.xlu1 %v1285_v47  ;;  %v1546_v14 = vpop.permute.xlu1 %374  ;;  %v1548_v20 = vpop.permute.xlu0 %528 }
  0x93   : > { %694 = vperm.xlu1 %1259, %v239_v8   ;;  %vm421_vm4 = vcmp.eq.s32.totalorder %v1546_v14, 1  ;;  %vm575_vm6 = vcmp.eq.s32.totalorder %v1548_v20, 1 }
  0x94   : > { %v460_v14 = vsel %vm421_vm4, %v1609_v52, %v1613_v54 }
  0x96   : > { %v1550_v23 = vpop.permute.xlu1 %398  ;;  %v1552_v24 = vpop.permute.xlu0 %555 }
  0x97   : > { %1260 = vset.pattern.permute.xlu1 %v1282_v0  ;;  %vm429_vm0 = vcmp.eq.s32.totalorder %v1550_v23, 1  ;;  %vm584_vm7 = vcmp.eq.s32.totalorder %v1552_v24, 1 }
  0x98   : > { %543 = vperm.xlu1 %1260, %v1417_v38   ;;  %v475_v16 = vsel %vm429_vm0, %v1607_v51, %v1611_v53 }
  0x9a   : > { %v1556_v25 = vpop.permute.xlu0 %537 }
  0x9b   : > { %v1558_v26 = vpop.permute.xlu1 %552  ;;  %vm578_vm8 = vcmp.eq.s32.totalorder %v1556_v25, 1 }
  0x9c   : > { %567 = vperm.xlu1 %1260, %v248_v15   ;;  %vm583_vm1 = vcmp.eq.s32.totalorder %v1558_v26, 1 }
  0x9e   : > { %v1560_v27 = vpop.permute.xlu0 %564 }
  0xa0   : > { %1261 = vset.pattern.permute.xlu1 %v1284_v5  ;;  %v1563_v28 = vpop.permute.xlu1 %255 }
  0xa1   : > { %294 = vperm.xlu1 %1261, %v1434_v45   ;;  %vm300_vm11 = vcmp.eq.s32.totalorder %v1563_v28, 1 }
  0xa3   : > { %v1566_v29 = vpop.permute.xlu0 %380 }
  0xa4   : > { %vm423_vm14 = vcmp.eq.s32.totalorder %v1566_v29, 1 }
  0xa5   : > { %1262 = vset.pattern.permute.xlu1 %v1283_v1  ;;  %v1569_v30 = vpop.permute.xlu1 %377 }
  0xa6   : > { %392 = vperm.xlu1 %1262, %v1504_v21   ;;  %vm422_vm9 = vcmp.eq.s32.totalorder %v1569_v30, 1 }
  0xa7   : > { %v1572_v31 = vpop.permute.xlu0 %407  ;;  %v462_v28 = vsel %vm422_vm9, %v1609_v52, %v1613_v54  ;;  %v461_v25 = vsel %vm422_vm9, %v1607_v51, %v1611_v53 }
  0xa9   : > { %v1574_v33 = vpop.permute.xlu1 %401 }
  0xaa   : > { %1264 = vset.pattern.permute.xlu1 %v1285_v47  ;;  %vm430_vm12 = vcmp.eq.s32.totalorder %v1574_v33, 1 }
  0xab   : > { %697 = vperm.xlu1 %1264, %v1417_v38   ;;  %v1578_v34 = vpop.permute.xlu0 %389  ;;  %v1091_v38 = vld [vmem:[%s2070_s2 + $0x2] ss:$4 sm:$0x3] }
  0xac   : > { %v1621_v57 = vrot.slane %v1091_v38, %v318_v40  ;;  %v1623_v58 = vrot.slane %v1091_v38, %v322_v41  ;;  %v459_v38 = vsel %vm421_vm4, %v1607_v51, %v1611_v53 }
  0xae   : > { %v707_v36 = vpop.permute.xlu1 %706  ;;  %v629_v6 = vsel %vm583_vm1, %v1621_v57, %v1625_v59  ;;  %v630_v8 = vsel %vm583_vm1, %v1623_v58, %v1630_v61  ;;  %v613_v48 = vsel %vm575_vm6, %v1621_v57, %v1625_v59  ;;  %v614_v49 = vsel %vm575_vm6, %v1623_v58, %v1630_v61 }
  0xaf   : > { %721 = vperm.xlu1 %1264, %v248_v15   ;;  %v1580_v37 = vpop.permute.xlu0 %416  ;;  %vm737_vm3 = vcmp.eq.s32.totalorder %v707_v36, 1  ;;  %v1728_v56 = vsel %vm578_vm8, %v1621_v57, %v1625_v59 }
  0xb0   : > { %v783_v32 = vsel %vm737_vm3, %v1641_v4, %v1643_v7  ;;  %v784_v35 = vsel %vm737_vm3, %v1650_v13, %v1652_v9 }
  0xb3   : > { %1265 = vset.pattern.permute.xlu1 %v1282_v0  ;;  %v1596_v46 = vpop.permute.xlu1 %531 }
  0xb4   : > { %v1604_v50 = vpop.permute.xlu0 %252  ;;  %570 = vperm.xlu1 %1265, %v1434_v45   ;;  %vm576_vm13 = vcmp.eq.s32.totalorder %v1596_v46, 1 }
  0xb5   : > { %vm299_vm5 = vcmp.eq.s32.totalorder %v1604_v50, 1  ;;  %v631_v50 = vsel %vm584_vm7, %v1621_v57, %v1625_v59  ;;  %v616_v30 = vsel %vm576_vm13, %v1623_v58, %v1630_v61 }
  0xb6   : > { %v338_v44 = vsel %vm299_vm5, %v1635_v63, %v1639_v3 }
  0xb8   : > { %v277_v10 = vpop.permute.xlu0 %276  ;;  %1266 = vset.pattern.permute.xlu1 %v1284_v5  ;;  %v1646_v12 = vpop.permute.xlu1 %258  ;;  %v476_v5 = vsel %vm429_vm0, %v1609_v52, %v1613_v54 }
  0xb9   : > { %vm307_vm2 = vcmp.eq.s32.totalorder %v277_v10, 1  ;;  %273 = vperm.xlu1 %1266, %v1628_v60   ;;  %vm301_vm1 = vcmp.eq.s32.totalorder %v1646_v12, 1 }
  0xba   : > { %v353_v17 = vsel %vm307_vm2, %v1633_v62, %v1637_v2  ;;  %v354_v18 = vsel %vm307_vm2, %v1635_v63, %v1639_v3 }
  0xbb   : > { %v507_v19 = vmul.f32 %v475_v16, %v353_v17  ;;  %v508_v21 = vmul.f32 %v476_v5, %v354_v18  ;;  %v492_v16 = vmul.f32 %v460_v14, %v338_v44  ;;  %v1743_v5 = vsel %vm578_vm8, %v1623_v58, %v1630_v61 }
  0xbc   : > { %v280_v11 = vpop.permute.xlu0 %279  ;;  %v1670_v15 = vpop.permute.xlu1 %282  ;;  %v339_v17 = vsel %vm300_vm11, %v1633_v62, %v1637_v2  ;;  %v340_v18 = vsel %vm300_vm11, %v1635_v63, %v1639_v3 }
  0xbd   : > { %v661_v23 = vmul.f32 %v629_v6, %v507_v19  ;;  %1268 = vset.pattern.permute.xlu1 %v1283_v1  ;;  %v662_v26 = vmul.f32 %v630_v8, %v508_v21  ;;  %vm308_vm10 = vcmp.eq.s32.totalorder %v280_v11, 1  ;;  %v477_v6 = vsel %vm430_vm12, %v1607_v51, %v1611_v53 }
  0xbe   : > { %395 = vperm.xlu1 %1268, %v1628_v60   ;;  %v355_v24 = vsel %vm308_vm10, %v1633_v62, %v1637_v2  ;;  %v356_v19 = vsel %vm308_vm10, %v1635_v63, %v1639_v3  ;;  %v494_v8 = vmul.f32 %v462_v28, %v340_v18  ;;  %v478_v11 = vsel %vm430_vm12, %v1609_v52, %v1613_v54 }
  0xbf   : > { %v816_v36 = vmul.f32 %v784_v35, %v662_v26  ;;  %v815_v39 = vmul.f32 %v783_v32, %v661_v23  ;;  %v509_v23 = vmul.f32 %v477_v6, %v355_v24  ;;  %v510_v32 = vmul.f32 %v478_v11, %v356_v19 }
  0xc0   : > { %v1678_v40 = vpop.permute.xlu0 %261  ;;  %v648_v14 = vmul.f32 %v616_v30, %v494_v8  ;;  %v341_v19 = vsel %vm301_vm1, %v1633_v62, %v1637_v2  ;;  %vm309_vm6 = vcmp.eq.s32.totalorder %v1670_v15, 1  ;;  %vm432_vm12 = vcmp.eq.s32.totalorder %v1572_v31, 1 }
  0xc1   : > { %967 = vmatprep.mubr.f32.mxu1 %v816_v36  ;;  %v1680_v41 = vpop.permute.xlu1 %404  ;;  %v646_v36 = vmul.f32 %v614_v49, %v492_v16  ;;  %v493_v49 = vmul.f32 %v461_v25, %v339_v17  ;;  %vm302_vm2 = vcmp.eq.s32.totalorder %v1678_v40, 1  ;;  %v342_v25 = vsel %vm301_vm1, %v1635_v63, %v1639_v3 }
  0xc2   : > { %419 = vperm.xlu1 %1268, %v1509_v22   ;;  %968 = vmatmul.mubr.f32.vlgmr.msra.gmra.mrb[0].mxu1 %v815_v39  ;;  %vm431_vm4 = vcmp.eq.s32.totalorder %v1680_v41, 1  ;;  %v344_v29 = vsel %vm302_vm2, %v1635_v63, %v1639_v3  ;;  %v343_v11 = vsel %vm302_vm2, %v1633_v62, %v1637_v2 }
  0xc3   : > { %v479_v12 = vsel %vm431_vm4, %v1607_v51, %v1611_v53 }
  0xc4   : > { %v1683_v1 = vpop.permute.xlu0 %288 }
  0xc6   : > { %1270 = vset.pattern.permute.xlu1 %v1285_v47  ;;  %v1686_v42 = vpop.permute.xlu1 %685 }
  0xc7   : > { %724 = vperm.xlu1 %1270, %v1434_v45   ;;  %v337_v45 = vsel %vm299_vm5, %v1633_v62, %v1637_v2  ;;  %vm730_vm15 = vcmp.eq.s32.totalorder %v1686_v42, 1 }
  0xc8   : > { %v1691_v43 = vpop.permute.xlu0 %270  ;;  %v491_v10 = vmul.f32 %v459_v38, %v337_v45  ;;  %v770_v33 = vsel %vm730_vm15, %v1650_v13, %v1652_v9  ;;  %v615_v38 = vsel %vm576_vm13, %v1621_v57, %v1625_v59  ;;  %v769_v46 = vsel %vm730_vm15, %v1641_v4, %v1643_v7 }
  0xc9   : > { %v802_v16 = vmul.f32 %v770_v33, %v648_v14  ;;  %v647_v18 = vmul.f32 %v615_v38, %v493_v49  ;;  %vm311_vm13 = vcmp.eq.s32.totalorder %v1683_v1, 1  ;;  %vm587_vm15 = vcmp.eq.s32.totalorder %v1560_v27, 1 }
  0xca   : > { %v645_v35 = vmul.f32 %v613_v48, %v491_v10  ;;  %v663_v10 = vmul.f32 %v631_v50, %v509_v23 }
  0xcb   : > { %1271 = vset.pattern.permute.xlu1 %v1282_v0  ;;  %v1706_v20 = vpop.permute.xlu1 %534  ;;  %v632_v0 = vsel %vm584_vm7, %v1623_v58, %v1630_v61  ;;  %v801_v6 = vmul.f32 %v769_v46, %v647_v18 }
  0xcc   : > { %549 = vperm.xlu1 %1271, %v1628_v60   ;;  %v1718_v55 = vpop.permute.xlu0 %297  ;;  %v664_v24 = vmul.f32 %v632_v0, %v510_v32  ;;  %vm577_vm5 = vcmp.eq.s32.totalorder %v1706_v20, 1  ;;  %v480_v20 = vsel %vm431_vm4, %v1609_v52, %v1613_v54 }
  0xcd   : > { %v617_v23 = vsel %vm577_vm5, %v1621_v57, %v1625_v59 }
  0xcf   : > { %v1752_v21 = vpop.permute.xlu1 %558 }
  0xd0   : > { %1272 = vset.pattern.permute.xlu1 %v1285_v47  ;;  %v463_v47 = vsel %vm423_vm14, %v1607_v51, %v1611_v53  ;;  %vm585_vm8 = vcmp.eq.s32.totalorder %v1752_v21, 1 }
  0xd1   : > { %v683_v26 = vpop.permute.xlu0 %682  ;;  %703 = vperm.xlu1 %1272, %v1628_v60   ;;  %v495_v32 = vmul.f32 %v463_v47, %v341_v19  ;;  %v634_v15 = vsel %vm585_vm8, %v1623_v58, %v1630_v61 }
  0xd2   : > { %vm729_vm0 = vcmp.eq.s32.totalorder %v683_v26, 1 }
  0xd3   : > { %v767_v39 = vsel %vm729_vm0, %v1641_v4, %v1643_v7  ;;  %v768_v60 = vsel %vm729_vm0, %v1650_v13, %v1652_v9  ;;  %v649_v21 = vmul.f32 %v617_v23, %v495_v32 }
  0xd4   : > { %v799_v45 = vmul.f32 %v767_v39, %v645_v35  ;;  %v1790_v44 = vpop.permute.xlu1 %285  ;;  %v800_v48 = vmul.f32 %v768_v60, %v646_v36  ;;  %v618_v35 = vsel %vm577_vm5, %v1623_v58, %v1630_v61  ;;  %v357_v39 = vsel %vm309_vm6, %v1633_v62, %v1637_v2 }
  0xd5   : > { %v710_v28 = vpop.permute.xlu0 %709  ;;  %727 = vperm.xlu1 %1272, %v1509_v22   ;;  %v464_v22 = vsel %vm423_vm14, %v1609_v52, %v1613_v54  ;;  %v358_v60 = vsel %vm309_vm6, %v1635_v63, %v1639_v3  ;;  %v511_v47 = vmul.f32 %v479_v12, %v357_v39  ;;  %vm310_vm14 = vcmp.eq.s32.totalorder %v1790_v44, 1 }
  0xd6   : > { %vm738_vm3 = vcmp.eq.s32.totalorder %v710_v28, 1  ;;  %927 = vmatprep.mubr.f32.mxu0 %v800_v48  ;;  %v496_v33 = vmul.f32 %v464_v22, %v342_v25  ;;  %v633_v48 = vsel %vm585_vm8, %v1621_v57, %v1625_v59  ;;  %v512_v46 = vmul.f32 %v480_v20, %v358_v60 }
  0xd7   : > { %v785_v17 = vsel %vm738_vm3, %v1641_v4, %v1643_v7  ;;  %v786_v50 = vsel %vm738_vm3, %v1650_v13, %v1652_v9  ;;  %928 = vmatmul.mubr.f32.vlgmr.msra.gmra.mrb[0].mxu0 %v799_v45  ;;  %v665_v18 = vmul.f32 %v633_v48, %v511_v47  ;;  %v481_v12 = vsel %vm432_vm12, %v1607_v51, %v1611_v53 }
  0xd8   : > { %v817_v42 = vmul.f32 %v785_v17, %v663_v10  ;;  %v818_v0 = vmul.f32 %v786_v50, %v664_v24  ;;  %932 = vmatprep.mubr.f32.mxu0 %v802_v16  ;;  %v650_v45 = vmul.f32 %v618_v35, %v496_v33  ;;  %v666_v50 = vmul.f32 %v634_v15, %v512_v46 }
  0xd9   : > { %v384_v8 = vpop.permute.xlu1 %383  ;;  %v692_v30 = vpop.permute.xlu0 %691  ;;  %v359_v31 = vsel %vm310_vm14, %v1633_v62, %v1637_v2  ;;  %v360_v1 = vsel %vm310_vm14, %v1635_v63, %v1639_v3  ;;  %vm426_vm8 = vcmp.eq.s32.totalorder %v1578_v34, 1 }
  0xda   : > { %vm424_vm7 = vcmp.eq.s32.totalorder %v384_v8, 1  ;;  %972 = vmatprep.mubr.f32.mxu1 %v818_v0  ;;  %vm732_vm9 = vcmp.eq.s32.totalorder %v692_v30, 1  ;;  %v362_v30 = vsel %vm311_vm13, %v1635_v63, %v1639_v3  ;;  %v513_v20 = vmul.f32 %v481_v12, %v359_v31 }
  0xdb   : > { %v465_v26 = vsel %vm424_vm7, %v1607_v51, %v1611_v53  ;;  %v466_v40 = vsel %vm424_vm7, %v1609_v52, %v1613_v54  ;;  %933 = vmatmul.mubr.f32.gmra.mrb[2].mxu0 %v801_v6  ;;  %973 = vmatmul.mubr.f32.gmra.mrb[2].mxu1 %v817_v42  ;;  %v774_v28 = vsel %vm732_vm9, %v1650_v13, %v1652_v9 }
  0xdc   : > { %v498_v36 = vmul.f32 %v466_v40, %v344_v29  ;;  %v497_v38 = vmul.f32 %v465_v26, %v343_v11  ;;  %v773_v22 = vsel %vm732_vm9, %v1641_v4, %v1643_v7  ;;  %v482_v26 = vsel %vm432_vm12, %v1609_v52, %v1613_v54 }
  0xdd   : > { %v719_v44 = vpop.permute.xlu0 %718  ;;  %v361_v40 = vsel %vm311_vm13, %v1633_v62, %v1637_v2  ;;  %v514_v47 = vmul.f32 %v482_v26, %v360_v1  ;;  %vm305_vm9 = vcmp.eq.s32.totalorder %v1691_v43, 1 }
  0xde   : > { %v689_v14 = vpop.permute.xlu1 %688  ;;  %v652_v49 = vmul.f32 %v1743_v5, %v498_v36  ;;  %v651_v5 = vmul.f32 %v1728_v56, %v497_v38  ;;  %v638_v36 = vsel %vm587_vm15, %v1623_v58, %v1630_v61  ;;  %vm741_vm2 = vcmp.eq.s32.totalorder %v719_v44, 1 }
  0xdf   : > { %vm731_vm10 = vcmp.eq.s32.totalorder %v689_v14, 1  ;;  %v792_v15 = vsel %vm741_vm2, %v1650_v13, %v1652_v9  ;;  %v791_v27 = vsel %vm741_vm2, %v1641_v4, %v1643_v7 }
  0xe0   : > { %v771_v41 = vsel %vm731_vm10, %v1641_v4, %v1643_v7  ;;  %v772_v10 = vsel %vm731_vm10, %v1650_v13, %v1652_v9  ;;  %v806_v42 = vmul.f32 %v774_v28, %v652_v49  ;;  %v805_v56 = vmul.f32 %v773_v22, %v651_v5 }
  0xe1   : > { %v803_v16 = vmul.f32 %v771_v41, %v649_v21  ;;  %v804_v24 = vmul.f32 %v772_v10, %v650_v45  ;;  %v637_v21 = vsel %vm587_vm15, %v1621_v57, %v1625_v59 }
  0xe2   : > { %v713_v17 = vpop.permute.xlu1 %712 }
  0xe3   : > { %vm739_vm11 = vcmp.eq.s32.totalorder %v713_v17, 1  ;;  %937 = vmatprep.mubr.f32.mxu0 %v804_v24 }
  0xe4   : > { %v787_v0 = vsel %vm739_vm11, %v1641_v4, %v1643_v7  ;;  %v788_v19 = vsel %vm739_vm11, %v1650_v13, %v1652_v9  ;;  %938 = vmatmul.mubr.f32.gmra.mrb[4].mxu0 %v803_v16 }
  0xe5   : > { %v819_v25 = vmul.f32 %v787_v0, %v665_v18  ;;  %v820_v29 = vmul.f32 %v788_v19, %v666_v50  ;;  %942 = vmatprep.mubr.f32.mxu0 %v806_v42 }
  0xe7   : > { %977 = vmatprep.mubr.f32.mxu1 %v820_v29  ;;  %v562_v6 = vpop.permute.xlu1 %561 }
  0xe8   : > { %943 = vmatmul.mubr.f32.gmra.mrb[6].mxu0 %v805_v56  ;;  %978 = vmatmul.mubr.f32.gmra.mrb[4].mxu1 %v819_v25  ;;  %vm586_vm0 = vcmp.eq.s32.totalorder %v562_v6, 1 }
  0xe9   : > { %v635_v33 = vsel %vm586_vm0, %v1621_v57, %v1625_v59  ;;  %v636_v39 = vsel %vm586_vm0, %v1623_v58, %v1630_v61 }
  0xea   : > { %v667_v45 = vmul.f32 %v635_v33, %v513_v20  ;;  %v668_v48 = vmul.f32 %v636_v39, %v514_v47  ;;  %v469_v33 = vsel %vm426_vm8, %v1607_v51, %v1611_v53  ;;  %v470_v39 = vsel %vm426_vm8, %v1609_v52, %v1613_v54 }
  0xeb   : > { %v350_v20 = vsel %vm305_vm9, %v1635_v63, %v1639_v3 }
  0xec   : > { %v265_v8 = vpop.permute.xlu1 %264 }
  0xed   : > { %vm303_vm5 = vcmp.eq.s32.totalorder %v265_v8, 1 }
  0xee   : > { %v345_v19 = vsel %vm303_vm5, %v1633_v62, %v1637_v2  ;;  %v346_v25 = vsel %vm303_vm5, %v1635_v63, %v1639_v3  ;;  %vm435_vm5 = vcmp.eq.s32.totalorder %v1580_v37, 1 }
  0xf1   : > { %v387_v11 = vpop.permute.xlu1 %386 }
  0xf2   : > { %vm425_vm4 = vcmp.eq.s32.totalorder %v387_v11, 1 }
  0xf3   : > { %v467_v42 = vsel %vm425_vm4, %v1607_v51, %v1611_v53  ;;  %v468_v0 = vsel %vm425_vm4, %v1609_v52, %v1613_v54 }
  0xf4   : > { %v499_v6 = vmul.f32 %v467_v42, %v345_v19  ;;  %v500_v8 = vmul.f32 %v468_v0, %v346_v25 }
  0xf5   : > { %v411_v23 = vpop.permute.xlu1 %410 }
  0xf6   : > { %vm433_vm1 = vcmp.eq.s32.totalorder %v411_v23, 1 }
  0xf7   : > { %v483_v32 = vsel %vm433_vm1, %v1607_v51, %v1611_v53  ;;  %v484_v35 = vsel %vm433_vm1, %v1609_v52, %v1613_v54 }
  0xf8   : > { %v516_v60 = vmul.f32 %v484_v35, %v362_v30  ;;  %v515_v38 = vmul.f32 %v483_v32, %v361_v40  ;;  %v701_v32 = vpop.permute.xlu0 %700 }
  0xf9   : > { %vm735_vm10 = vcmp.eq.s32.totalorder %v701_v32, 1 }
  0xfa   : > { %v716_v14 = vpop.permute.xlu1 %715  ;;  %v670_v49 = vmul.f32 %v638_v36, %v516_v60  ;;  %v669_v16 = vmul.f32 %v637_v21, %v515_v38  ;;  %v349_v60 = vsel %vm305_vm9, %v1633_v62, %v1637_v2  ;;  %v780_v34 = vsel %vm735_vm10, %v1650_v13, %v1652_v9 }
  0xfb   : > { %vm740_vm3 = vcmp.eq.s32.totalorder %v716_v14, 1 }
  0xfc   : > { %v789_v28 = vsel %vm740_vm3, %v1641_v4, %v1643_v7  ;;  %v790_v41 = vsel %vm740_vm3, %v1650_v13, %v1652_v9  ;;  %v824_v24 = vmul.f32 %v792_v15, %v670_v49  ;;  %v823_v5 = vmul.f32 %v791_v27, %v669_v16  ;;  %v547_v36 = vpop.permute.xlu0 %546 }
  0xfd   : > { %v821_v10 = vmul.f32 %v789_v28, %v667_v45  ;;  %v822_v46 = vmul.f32 %v790_v41, %v668_v48  ;;  %vm581_vm12 = vcmp.eq.s32.totalorder %v547_v36, 1 }
  0xfe   : > { %v625_v45 = vsel %vm581_vm12, %v1621_v57, %v1625_v59  ;;  %v626_v28 = vsel %vm581_vm12, %v1623_v58, %v1630_v61 }
  0xff   : > { %982 = vmatprep.mubr.f32.mxu1 %v822_v46  ;;  %v541_v18 = vpop.permute.xlu1 %540 }
 0x100   : > { %983 = vmatmul.mubr.f32.gmra.mrb[6].mxu1 %v821_v10  ;;  %vm579_vm6 = vcmp.eq.s32.totalorder %v541_v18, 1 }
 0x101   : > { %987 = vmatprep.mubr.f32.mxu1 %v824_v24  ;;  %v621_v29 = vsel %vm579_vm6, %v1621_v57, %v1625_v59  ;;  %v622_v56 = vsel %vm579_vm6, %v1623_v58, %v1630_v61 }
 0x102   : > { %v653_v12 = vmul.f32 %v621_v29, %v499_v6  ;;  %v654_v30 = vmul.f32 %v622_v56, %v500_v8 }
 0x104   : > { %988 = vmatmul.mubr.f32.gmra.mrb[8].mxu1 %v823_v5  ;;  %v268_v17 = vpop.permute.xlu1 %267 }
 0x105   : > { %vm304_vm11 = vcmp.eq.s32.totalorder %v268_v17, 1 }
 0x106   : > { %v347_v47 = vsel %vm304_vm11, %v1633_v62, %v1637_v2  ;;  %v348_v21 = vsel %vm304_vm11, %v1635_v63, %v1639_v3  ;;  %vm314_vm11 = vcmp.eq.s32.totalorder %v1718_v55, 1 }
 0x107   : > { %v501_v41 = vmul.f32 %v469_v33, %v347_v47  ;;  %v502_v10 = vmul.f32 %v470_v39, %v348_v21  ;;  %v487_v47 = vsel %vm435_vm5, %v1607_v51, %v1611_v53  ;;  %v488_v21 = vsel %vm435_vm5, %v1609_v52, %v1613_v54 }
 0x108   : > { %v292_v50 = vpop.permute.xlu1 %291 }
 0x109   : > { %vm312_vm14 = vcmp.eq.s32.totalorder %v292_v50, 1 }
 0x10a   : > { %v363_v46 = vsel %vm312_vm14, %v1633_v62, %v1637_v2  ;;  %v364_v16 = vsel %vm312_vm14, %v1635_v63, %v1639_v3 }
 0x10d   : > { %v414_v22 = vpop.permute.xlu1 %413 }
 0x10e   : > { %vm434_vm0 = vcmp.eq.s32.totalorder %v414_v22, 1 }
 0x10f   : > { %v485_v27 = vsel %vm434_vm0, %v1607_v51, %v1611_v53  ;;  %v486_v24 = vsel %vm434_vm0, %v1609_v52, %v1613_v54 }
 0x110   : > { %v517_v29 = vmul.f32 %v485_v27, %v363_v46  ;;  %v518_v56 = vmul.f32 %v486_v24, %v364_v16  ;;  %v574_v24 = vpop.permute.xlu0 %573 }
 0x112   : > { %v695_v11 = vpop.permute.xlu1 %694 }
 0x113   : > { %vm733_vm7 = vcmp.eq.s32.totalorder %v695_v11, 1  ;;  %v779_v11 = vsel %vm735_vm10, %v1641_v4, %v1643_v7 }
 0x114   : > { %v775_v23 = vsel %vm733_vm7, %v1641_v4, %v1643_v7  ;;  %v776_v26 = vsel %vm733_vm7, %v1650_v13, %v1652_v9 }
 0x115   : > { %v807_v31 = vmul.f32 %v775_v23, %v653_v12  ;;  %v808_v1 = vmul.f32 %v776_v26, %v654_v30 }
 0x117   : > { %947 = vmatprep.mubr.f32.mxu0 %v808_v1  ;;  %v544_v44 = vpop.permute.xlu1 %543 }
 0x118   : > { %948 = vmatmul.mubr.f32.gmra.mrb[8].mxu0 %v807_v31  ;;  %vm580_vm13 = vcmp.eq.s32.totalorder %v544_v44, 1 }
 0x119   : > { %v623_v48 = vsel %vm580_vm13, %v1621_v57, %v1625_v59  ;;  %v624_v49 = vsel %vm580_vm13, %v1623_v58, %v1630_v61  ;;  %vm590_vm13 = vcmp.eq.s32.totalorder %v574_v24, 1 }
 0x11a   : > { %v655_v17 = vmul.f32 %v623_v48, %v501_v41  ;;  %v656_v50 = vmul.f32 %v624_v49, %v502_v10 }
 0x11b   : > { %v568_v40 = vpop.permute.xlu1 %567 }
 0x11c   : > { %vm588_vm1 = vcmp.eq.s32.totalorder %v568_v40, 1 }
 0x11d   : > { %v639_v42 = vsel %vm588_vm1, %v1621_v57, %v1625_v59  ;;  %v640_v0 = vsel %vm588_vm1, %v1623_v58, %v1630_v61 }
 0x11e   : > { %v671_v23 = vmul.f32 %v639_v42, %v517_v29  ;;  %v672_v26 = vmul.f32 %v640_v0, %v518_v56  ;;  %v367_v0 = vsel %vm314_vm11, %v1633_v62, %v1637_v2 }
 0x120   : > { %v1931_v35 = vpop.permute.xlu1 %294 }
 0x121   : > { %vm313_vm4 = vcmp.eq.s32.totalorder %v1931_v35, 1 }
 0x125   : > { %v393_v43 = vpop.permute.xlu1 %392 }
 0x126   : > { %vm427_vm15 = vcmp.eq.s32.totalorder %v393_v43, 1  ;;  %v366_v43 = vsel %vm313_vm4, %v1635_v63, %v1639_v3 }
 0x127   : > { %v471_v38 = vsel %vm427_vm15, %v1607_v51, %v1611_v53  ;;  %v472_v14 = vsel %vm427_vm15, %v1609_v52, %v1613_v54 }
 0x128   : > { %v504_v15 = vmul.f32 %v472_v14, %v350_v20  ;;  %v503_v18 = vmul.f32 %v471_v38, %v349_v60  ;;  %v520_v14 = vmul.f32 %v488_v21, %v366_v43 }
 0x12a   : > { %v698_v5 = vpop.permute.xlu1 %697  ;;  %v658_v22 = vmul.f32 %v626_v28, %v504_v15  ;;  %v657_v12 = vmul.f32 %v625_v45, %v503_v18 }
 0x12b   : > { %vm734_vm2 = vcmp.eq.s32.totalorder %v698_v5, 1 }
 0x12c   : > { %v777_v19 = vsel %vm734_vm2, %v1641_v4, %v1643_v7  ;;  %v778_v25 = vsel %vm734_vm2, %v1650_v13, %v1652_v9  ;;  %v812_v31 = vmul.f32 %v780_v34, %v658_v22  ;;  %v811_v33 = vmul.f32 %v779_v11, %v657_v12 }
 0x12d   : > { %v809_v6 = vmul.f32 %v777_v19, %v655_v17  ;;  %v810_v8 = vmul.f32 %v778_v25, %v656_v50  ;;  %v365_v34 = vsel %vm313_vm4, %v1633_v62, %v1637_v2 }
 0x12e   : > { %v722_v30 = vpop.permute.xlu1 %721  ;;  %v519_v35 = vmul.f32 %v487_v47, %v365_v34 }
 0x12f   : > { %vm742_vm3 = vcmp.eq.s32.totalorder %v722_v30, 1  ;;  %952 = vmatprep.mubr.f32.mxu0 %v810_v8 }
 0x130   : > { %v793_v1 = vsel %vm742_vm3, %v1641_v4, %v1643_v7  ;;  %v794_v44 = vsel %vm742_vm3, %v1650_v13, %v1652_v9  ;;  %953 = vmatmul.mubr.f32.gmra.mrb[10].mxu0 %v809_v6  ;;  %v643_v6 = vsel %vm590_vm13, %v1621_v57, %v1625_v59 }
 0x131   : > { %v825_v40 = vmul.f32 %v793_v1, %v671_v23  ;;  %v826_v36 = vmul.f32 %v794_v44, %v672_v26  ;;  %957 = vmatprep.mubr.f32.mxu0 %v812_v31 }
 0x133   : > { %992 = vmatprep.mubr.f32.mxu1 %v826_v36  ;;  %v571_v32 = vpop.permute.xlu1 %570 }
 0x134   : > { %958 = vmatmul.mubr.f32.gmra.mrb[12].mxu0 %v811_v33  ;;  %993 = vmatmul.mubr.f32.gmra.mrb[10].mxu1 %v825_v40  ;;  %vm589_vm6 = vcmp.eq.s32.totalorder %v571_v32, 1 }
 0x135   : > { %v641_v38 = vsel %vm589_vm6, %v1621_v57, %v1625_v59  ;;  %v642_v37 = vsel %vm589_vm6, %v1623_v58, %v1630_v61 }
 0x136   : > { %v673_v48 = vmul.f32 %v641_v38, %v519_v35  ;;  %v674_v49 = vmul.f32 %v642_v37, %v520_v14 }
 0x138   : > { %v274_v39 = vpop.permute.xlu1 %273 }
 0x139   : > { %vm306_vm9 = vcmp.eq.s32.totalorder %v274_v39, 1 }
 0x13a   : > { %v351_v18 = vsel %vm306_vm9, %v1633_v62, %v1637_v2  ;;  %v352_v17 = vsel %vm306_vm9, %v1635_v63, %v1639_v3  ;;  %v644_v62 = vsel %vm590_vm13, %v1623_v58, %v1630_v61 }
 0x13d   : > { %v396_v60 = vpop.permute.xlu1 %395 }
 0x13e   : > { %vm428_vm8 = vcmp.eq.s32.totalorder %v396_v60, 1 }
 0x13f   : > { %v473_v16 = vsel %vm428_vm8, %v1607_v51, %v1611_v53  ;;  %v474_v27 = vsel %vm428_vm8, %v1609_v52, %v1613_v54 }
 0x140   : > { %v505_v19 = vmul.f32 %v473_v16, %v351_v18  ;;  %v506_v25 = vmul.f32 %v474_v27, %v352_v17 }
 0x141   : > { %v420_v20 = vpop.permute.xlu1 %419 }
 0x142   : > { %vm436_vm10 = vcmp.eq.s32.totalorder %v420_v20, 1 }
 0x143   : > { %v489_v5 = vsel %vm436_vm10, %v1607_v51, %v1611_v53  ;;  %v490_v50 = vsel %vm436_vm10, %v1609_v52, %v1613_v54  ;;  %v368_v51 = vsel %vm314_vm11, %v1635_v63, %v1639_v3 }
 0x144   : > { %v521_v52 = vmul.f32 %v489_v5, %v367_v0  ;;  %v522_v54 = vmul.f32 %v490_v50, %v368_v51 }
 0x146   : > { %v725_v45 = vpop.permute.xlu1 %724  ;;  %v675_v11 = vmul.f32 %v643_v6, %v521_v52  ;;  %v676_v12 = vmul.f32 %v644_v62, %v522_v54 }
 0x147   : > { %vm743_vm7 = vcmp.eq.s32.totalorder %v725_v45, 1 }
 0x148   : > { %v795_v15 = vsel %vm743_vm7, %v1641_v4, %v1643_v7  ;;  %v796_v28 = vsel %vm743_vm7, %v1650_v13, %v1652_v9 }
 0x149   : > { %v827_v41 = vmul.f32 %v795_v15, %v673_v48  ;;  %v828_v10 = vmul.f32 %v796_v28, %v674_v49 }
 0x14b   : > { %997 = vmatprep.mubr.f32.mxu1 %v828_v10  ;;  %v550_v46 = vpop.permute.xlu1 %549 }
 0x14c   : > { %vm582_vm12 = vcmp.eq.s32.totalorder %v550_v46, 1  ;;  %998 = vmatmul.mubr.f32.gmra.mrb[12].mxu1 %v827_v41 }
 0x14d   : > { %v627_v22 = vsel %vm582_vm12, %v1621_v57, %v1625_v59  ;;  %v628_v42 = vsel %vm582_vm12, %v1623_v58, %v1630_v61 }
 0x14e   : > { %v659_v29 = vmul.f32 %v627_v22, %v505_v19  ;;  %v660_v56 = vmul.f32 %v628_v42, %v506_v25 }
 0x150   : > { %v704_v53 = vpop.permute.xlu1 %703 }
 0x151   : > { %vm736_vm14 = vcmp.eq.s32.totalorder %v704_v53, 1 }
 0x152   : > { %v781_v2 = vsel %vm736_vm14, %v1641_v4, %v1643_v7  ;;  %v782_v8 = vsel %vm736_vm14, %v1650_v13, %v1652_v9 }
 0x153   : > { %v813_v63 = vmul.f32 %v781_v2, %v659_v29  ;;  %v814_v3 = vmul.f32 %v782_v8, %v660_v56 }
 0x154   : > { %v728_v55 = vpop.permute.xlu1 %727 }
 0x155   : > { %vm744_vm15 = vcmp.eq.s32.totalorder %v728_v55, 1  ;;  %962 = vmatprep.mubr.f32.mxu0 %v814_v3 }
 0x156   : > { %v797_v57 = vsel %vm744_vm15, %v1641_v4, %v1643_v7  ;;  %v798_v58 = vsel %vm744_vm15, %v1650_v13, %v1652_v9  ;;  %963 = vmatmul.mubr.f32.gmra.mrb[14].mxu0 %v813_v63 }
 0x157   : > { %v829_v59 = vmul.f32 %v797_v57, %v675_v11  ;;  %v830_v61 = vmul.f32 %v798_v58, %v676_v12 }
 0x159   : > { %1002 = vmatprep.mubr.f32.mxu1 %v830_v61 }
 0x15a   : > { %1003 = vmatmul.mubr.f32.gmra.mrb[14].mxu1 %v829_v59 }
 0x195   : > { %v1153_v30 = vpop.f32.mrb[0].mxu1 }
 0x196   : > { %v1154_v4 = vpop.f32.mrb[1].mxu1 }
 0x197   : > { %v1155_v7 = vadd.f32 %v1154_v4, %v1153_v30 }
 0x199   : > { %1016 = vst [vmem:[%s2047_s11 + $0x40] sm:$0xff] %v1155_v7 }
 0x1aa   : > { %v1129_v13 = vpop.f32.mrb[0].mxu0 }
 0x1ab   : > { %v1130_v9 = vpop.f32.mrb[1].mxu0 }
 0x1ac   : > { %v1131_v23 = vadd.f32 %v1130_v9, %v1129_v13 }
 0x1ae   : > { %1008 = vst [vmem:[%s2047_s11] sm:$0xff] %v1131_v23  ;;  %v1132_v26 = vpop.f32.mrb[2].mxu0  ;;  %v1156_v31 = vpop.f32.mrb[2].mxu1 }
 0x1af   : > { %v1133_v1 = vpop.f32.mrb[3].mxu0  ;;  %v1157_v44 = vpop.f32.mrb[3].mxu1 }
 0x1b0   : > { %v1134_v40 = vadd.f32 %v1133_v1, %v1132_v26  ;;  %v1158_v36 = vadd.f32 %v1157_v44, %v1156_v31 }
 0x1b2   : > { %1009 = vst [vmem:[%s2047_s11 + $0x8] sm:$0xff] %v1134_v40  ;;  %1017 = vst [vmem:[%s2047_s11 + $0x48] sm:$0xff] %v1158_v36 }
 0x1b7   : > { %v1135_v33 = vpop.f32.mrb[4].mxu0 }
 0x1b8   : > { %v1136_v32 = vpop.f32.mrb[5].mxu0 }
 0x1b9   : > { %v1137_v39 = vadd.f32 %v1136_v32, %v1135_v33 }
 0x1bb   : > { %1010 = vst [vmem:[%s2047_s11 + $0x10] sm:$0xff] %v1137_v39  ;;  %v1138_v60 = vpop.f32.mrb[6].mxu0  ;;  %v1159_v20 = vpop.f32.mrb[4].mxu1 }
 0x1bc   : > { %v1139_v34 = vpop.f32.mrb[7].mxu0  ;;  %v1160_v43 = vpop.f32.mrb[5].mxu1 }
 0x1bd   : > { %v1140_v47 = vadd.f32 %v1139_v34, %v1138_v60  ;;  %v1161_v21 = vadd.f32 %v1160_v43, %v1159_v20 }
 0x1bf   : > { %1011 = vst [vmem:[%s2047_s11 + $0x18] sm:$0xff] %v1140_v47  ;;  %1018 = vst [vmem:[%s2047_s11 + $0x50] sm:$0xff] %v1161_v21 }
 0x1d3   : > { %v1162_v38 = vpop.f32.mrb[6].mxu1 }
 0x1d4   : > { %v1163_v37 = vpop.f32.mrb[7].mxu1 }
 0x1d5   : > { %v1164_v35 = vadd.f32 %v1163_v37, %v1162_v38 }
 0x1d7   : > { %1019 = vst [vmem:[%s2047_s11 + $0x58] sm:$0xff] %v1164_v35  ;;  %v1165_v14 = vpop.f32.mrb[8].mxu1 }
 0x1d8   : > { %v1166_v45 = vpop.f32.mrb[9].mxu1 }
 0x1d9   : > { %v1167_v48 = vadd.f32 %v1166_v45, %v1165_v14 }
 0x1db   : > { %1020 = vst [vmem:[%s2047_s11 + $0x60] sm:$0xff] %v1167_v48 }
 0x1eb   : > { %v1141_v49 = vpop.f32.mrb[8].mxu0 }
 0x1ec   : > { %v1142_v15 = vpop.f32.mrb[9].mxu0 }
 0x1ed   : > { %v1143_v28 = vadd.f32 %v1142_v15, %v1141_v49 }
 0x1ef   : > { %1012 = vst [vmem:[%s2047_s11 + $0x20] sm:$0xff] %v1143_v28 }
 0x203   : > { %v1144_v41 = vpop.f32.mrb[10].mxu0 }
 0x204   : > { %v1145_v10 = vpop.f32.mrb[11].mxu0 }
 0x205   : > { %v1146_v46 = vadd.f32 %v1145_v10, %v1144_v41 }
 0x207   : > { %1013 = vst [vmem:[%s2047_s11 + $0x28] sm:$0xff] %v1146_v46  ;;  %v1147_v16 = vpop.f32.mrb[12].mxu0  ;;  %v1168_v27 = vpop.f32.mrb[10].mxu1 }
 0x208   : > { %v1148_v24 = vpop.f32.mrb[13].mxu0  ;;  %v1169_v18 = vpop.f32.mrb[11].mxu1 }
 0x209   : > { %v1149_v5 = vadd.f32 %v1148_v24, %v1147_v16  ;;  %v1170_v17 = vadd.f32 %v1169_v18, %v1168_v27 }
 0x20b   : > { %1014 = vst [vmem:[%s2047_s11 + $0x30] sm:$0xff] %v1149_v5  ;;  %1021 = vst [vmem:[%s2047_s11 + $0x68] sm:$0xff] %v1170_v17 }
 0x21f   : > { %v1171_v50 = vpop.f32.mrb[12].mxu1 }
 0x220   : > { %v1172_v22 = vpop.f32.mrb[13].mxu1 }
 0x221   : > { %v1173_v42 = vadd.f32 %v1172_v22, %v1171_v50 }
 0x223   : > { %1022 = vst [vmem:[%s2047_s11 + $0x70] sm:$0xff] %v1173_v42 }
 0x229   : > { %v1150_v0 = vpop.f32.mrb[14].mxu0 }
 0x22a   : > { %v1151_v19 = vpop.f32.mrb[15].mxu0 }
 0x22b   : > { %v1152_v25 = vadd.f32 %v1151_v19, %v1150_v0 }
 0x22d   : > { %1015 = vst [vmem:[%s2047_s11 + $0x38] sm:$0xff] %v1152_v25  ;;  %v1174_v51 = vpop.f32.mrb[14].mxu1 }
 0x22e   : > { %v1175_v52 = vpop.f32.mrb[15].mxu1 }
 0x22f   : > { %v1176_v53 = vadd.f32 %v1175_v52, %v1174_v51 }
 0x231   : > { %1023 = vst [vmem:[%s2047_s11 + $0x78] sm:$0xff] %v1176_v53 }
 0x232 PF: > { %s14_s15 = sadd.s32 1, %s1280_s15  }
 0x233   : > { %p11_p4 = scmp.ge.s32.totalorder %s14_s15, 4  }
 0x235   :  { %13 = sbr.rel (!%p11_p4) target bundleno = 1 (0x1), region = 72 }

</bundles_post_ra>
